<compile_context>
chip_gen: v5e
topology: v5e:2x2
jax: 0.10.0
libtpu: 0.0.40
codegen_flags: <defaults>
</compile_context>

<pallas_src>
import jax
import jax.numpy as jnp
from jax.experimental import pallas as pl
from jax.experimental.pallas import tpu as pltpu


def mha_kernel(x_ref, wq_ref, wk_ref, wv_ref, wo_ref, bo_ref, o_ref, acc_ref):
    """One (batch, head) grid step.

    x_ref  : (T, Din)   input tokens for this batch element (block index depends on b only,
                        so it is DMA'd once per batch element and reused across heads)
    wq_ref : (Din, hd)  per-head Q weight, bf16, 1/sqrt(hd) pre-folded
    wk_ref : (Din, hd)  per-head K weight, bf16
    wv_ref : (Din, hd)  per-head V weight, bf16
    wo_ref : (hd, Dp)   per-head rows of the output projection, bf16, lane-padded to Dp
    bo_ref : (1, Dp)    output-projection bias, f32, lane-padded
    o_ref  : (T, Dp)    output block (revisited across the head axis)
    acc_ref: (T, Dp)    f32 accumulator scratch
    """
    h = pl.program_id(1)
    last_h = pl.num_programs(1) - 1

    # bf16 MXU operands, f32 accumulation.
    xb = x_ref[...].astype(jnp.bfloat16)                                   # (T, Din)

    q = jnp.dot(xb, wq_ref[...], preferred_element_type=jnp.float32).astype(jnp.bfloat16)
    k = jnp.dot(xb, wk_ref[...], preferred_element_type=jnp.float32).astype(jnp.bfloat16)
    v = jnp.dot(xb, wv_ref[...], preferred_element_type=jnp.float32).astype(jnp.bfloat16)

    # scores = q @ k^T via the NT dot_general form (no explicit transpose materialized).
    scores = jax.lax.dot_general(
        q, k, dimension_numbers=(((1,), (1,)), ((), ())),
        preferred_element_type=jnp.float32)                                # (T, T) f32

    # Causal mask. Large finite negative (not -inf) so fully-masked rows can never
    # produce exp(-inf - (-inf)) = NaN. Softmax math stays in f32.
    T = scores.shape[0]
    row = jax.lax.broadcasted_iota(jnp.int32, (T, T), 0)
    col = jax.lax.broadcasted_iota(jnp.int32, (T, T), 1)
    scores = jnp.where(col > row, jnp.float32(-1e30), scores)

    # Numerically-stable softmax; normalization deferred until after the PV matmul.
    m = jnp.max(scores, axis=-1, keepdims=True)
    p = jnp.exp(scores - m)                                                # (T, T) f32
    denom = jnp.sum(p, axis=-1, keepdims=True)                             # (T, 1) f32

    ctx = jnp.dot(p.astype(jnp.bfloat16), v,
                  preferred_element_type=jnp.float32)                      # (T, hd) f32
    ctx = ctx * pl.reciprocal(denom, approx=True)                          # EUP reciprocal

    # Per-head partial of the output projection; summing over heads == concat + full Wo.
    part = jnp.dot(ctx.astype(jnp.bfloat16), wo_ref[...],
                   preferred_element_type=jnp.float32)                     # (T, Dp) f32

    @pl.when(h == 0)
    def _():
        acc_ref[...] = bo_ref[...] + part

    @pl.when(h > 0)
    def _():
        acc_ref[...] += part

    @pl.when(h == last_h)
    def _():
        o_ref[...] = acc_ref[...].astype(o_ref.dtype)


def prepare_params(wq, wk, wv, wo, bo, *, num_heads):
    """One-time (init-time) weight repacking — NOT on the per-call path.

    * head-major stacks (H, Din, hd) for Q/K/V, bf16, 1/sqrt(hd) folded into Q
    * per-head output-projection rows (H, hd, Dp), bf16, feature dim padded to a
      multiple of 128 for lane-dense output stores
    * bias padded to (1, Dp), kept in f32 (added into the f32 accumulator)
    """
    din, dout = wq.shape
    hd = dout // num_heads
    dp = max(128, ((dout + 127) // 128) * 128)
    scale = 1.0 / (hd ** 0.5)

    def head_major(w):
        return w.reshape(din, num_heads, hd).transpose(1, 0, 2)

    wq_h = head_major(wq * scale).astype(jnp.bfloat16)          # (H, Din, hd)
    wk_h = head_major(wk).astype(jnp.bfloat16)
    wv_h = head_major(wv).astype(jnp.bfloat16)

    wo_h = wo.reshape(num_heads, hd, dout)                       # (H, hd, Dout)
    wo_h = jnp.pad(wo_h, ((0, 0), (0, 0), (0, dp - dout))).astype(jnp.bfloat16)
    bo_p = jnp.pad(bo, (0, dp - dout)).reshape(1, dp).astype(jnp.float32)
    return wq_h, wk_h, wv_h, wo_h, bo_p


def multi_head_attention(x, params, *, num_heads, dim_out):
    B, T, Din = x.shape
    wq_h, wk_h, wv_h, wo_h, bo_p = params
    H = num_heads
    hd = dim_out // H
    Dp = wo_h.shape[-1]

    out = pl.pallas_call(
        mha_kernel,
        out_shape=jax.ShapeDtypeStruct((B, T, Dp), x.dtype),
        grid_spec=pltpu.PrefetchScalarGridSpec(
            num_scalar_prefetch=0,
            grid=(B, H),                                   # batch parallel, head = reduction
            in_specs=[
                pl.BlockSpec((None, T, Din), lambda b, h: (b, 0, 0)),   # x (per batch)
                pl.BlockSpec((None, Din, hd), lambda b, h: (h, 0, 0)),  # Wq head h
                pl.BlockSpec((None, Din, hd), lambda b, h: (h, 0, 0)),  # Wk head h
                pl.BlockSpec((None, Din, hd), lambda b, h: (h, 0, 0)),  # Wv head h
                pl.BlockSpec((None, hd, Dp), lambda b, h: (h, 0, 0)),   # Wo rows head h
                pl.BlockSpec((1, Dp), lambda b, h: (0, 0)),             # bias
            ],
            out_specs=pl.BlockSpec((None, T, Dp), lambda b, h: (b, 0, 0)),
            scratch_shapes=[pltpu.VMEM((T, Dp), jnp.float32)],
        ),
        compiler_params=pltpu.CompilerParams(
            dimension_semantics=("parallel", "arbitrary"),
        ),
    )(x, wq_h, wk_h, wv_h, wo_h, bo_p)

    return out[:, :, :dim_out]                             # strip lane padding (wrapper side)


def reference(x, wq, wk, wv, wo, bo, *, num_heads):
    """Pure-JAX mirror of the PyTorch MultiHeadAttention forward (dropout=0)."""
    B, T, Din = x.shape
    Dout = wq.shape[1]
    hd = Dout // num_heads
    q = (x @ wq).reshape(B, T, num_heads, hd).transpose(0, 2, 1, 3)
    k = (x @ wk).reshape(B, T, num_heads, hd).transpose(0, 2, 1, 3)
    v = (x @ wv).reshape(B, T, num_heads, hd).transpose(0, 2, 1, 3)
    scores = jnp.einsum("bhqd,bhkd->bhqk", q, k)
    mask = jnp.triu(jnp.ones((T, T), bool), k=1)
    scores = jnp.where(mask, -jnp.inf, scores)
    attn = jax.nn.softmax(scores / (hd ** 0.5), axis=-1)
    ctx = jnp.einsum("bhqk,bhkd->bhqd", attn, v).transpose(0, 2, 1, 3).reshape(B, T, Dout)
    return ctx @ wo + bo


if __name__ == "__main__":
    # Module config: dim_in=32, dim_out=32, context_length=8, num_heads=4, qkv_bias=False
    B, T, Din, Dout, H = 2, 8, 32, 32, 4

    key = jax.random.PRNGKey(0)
    kx, kq, kk, kv, ko, kb = jax.random.split(key, 6)

    x = jax.random.normal(kx, (B, T, Din), dtype=jnp.float32)
    # Weights stored as (in, out) so y = x @ W (+ b) matches nn.Linear.
    wq = jax.random.normal(kq, (Din, Dout), dtype=jnp.float32) * 0.1
    wk = jax.random.normal(kk, (Din, Dout), dtype=jnp.float32) * 0.1
    wv = jax.random.normal(kv, (Din, Dout), dtype=jnp.float32) * 0.1
    wo = jax.random.normal(ko, (Dout, Dout), dtype=jnp.float32) * 0.1
    bo = jax.random.normal(kb, (Dout,), dtype=jnp.float32) * 0.1

    # Weight repacking is done once, off the per-call path.
    params = prepare_params(wq, wk, wv, wo, bo, num_heads=H)

    out = multi_head_attention(x, params, num_heads=H, dim_out=Dout)
    out = jax.block_until_ready(out)

    ref = reference(x, wq, wk, wv, wo, bo, num_heads=H)
    assert out.shape == (B, T, Dout)
    # Tolerance accounts for bf16 MXU operands (f32 accumulation) and the EUP
    # approximate reciprocal in the softmax normalization.
    assert jnp.allclose(out, ref, atol=3e-2, rtol=3e-2), "mismatch vs reference"

    print("KERNEL_OK")
</pallas_src>

<mosaic_0001>
module attributes {stable_mosaic.version = 11 : i64} {
  func.func @mha_kernel(%arg0: i32, %arg1: i32, %arg2: memref<1x8x32xf32, #tpu.memory_space<vmem>>, %arg3: memref<1x32x8xbf16, #tpu.memory_space<vmem>>, %arg4: memref<1x32x8xbf16, #tpu.memory_space<vmem>>, %arg5: memref<1x32x8xbf16, #tpu.memory_space<vmem>>, %arg6: memref<1x8x128xbf16, #tpu.memory_space<vmem>>, %arg7: memref<1x128xf32, #tpu.memory_space<vmem>>, %arg8: memref<1x8x128xf32, #tpu.memory_space<vmem>>, %arg9: memref<8x128xf32, #tpu.memory_space<vmem>>) attributes {dimension_semantics = [#tpu.dimension_semantics<parallel>, #tpu.dimension_semantics<arbitrary>], iteration_bounds = array<i64: 2, 4>, scalar_prefetch = 0 : i64, scratch_operands = 1 : i64, tpu.core_type = #tpu.core_type<tc>, window_params = [{transform_indices = @transform_0, window_bounds = array<i64: 1, 8, 32>}, {transform_indices = @transform_1, window_bounds = array<i64: 1, 32, 8>}, {transform_indices = @transform_2, window_bounds = array<i64: 1, 32, 8>}, {transform_indices = @transform_3, window_bounds = array<i64: 1, 32, 8>}, {transform_indices = @transform_4, window_bounds = array<i64: 1, 8, 128>}, {pipeline_mode = #tpu.pipeline_mode<synchronous>, transform_indices = @transform_5, window_bounds = array<i64: 1, 128>}, {transform_indices = @transform_6, window_bounds = array<i64: 1, 8, 128>}]} {
    %c0 = arith.constant 0 : index
    %c0_0 = arith.constant 0 : index
    %c0_1 = arith.constant 0 : index
    %0 = vector.load %arg2[%c0, %c0_0, %c0_1] : memref<1x8x32xf32, #tpu.memory_space<vmem>>, vector<1x8x32xf32>
    %1 = vector.shape_cast %0 : vector<1x8x32xf32> to vector<8x32xf32>
    %2 = arith.truncf %1 : vector<8x32xf32> to vector<8x32xbf16>
    %c0_2 = arith.constant 0 : index
    %c0_3 = arith.constant 0 : index
    %c0_4 = arith.constant 0 : index
    %3 = vector.load %arg3[%c0_2, %c0_3, %c0_4] : memref<1x32x8xbf16, #tpu.memory_space<vmem>>, vector<1x32x8xbf16>
    %4 = vector.shape_cast %3 : vector<1x32x8xbf16> to vector<32x8xbf16>
    %cst = arith.constant dense<0.000000e+00> : vector<8x8xf32>
    %5 = tpu.matmul %2, %4, %cst {dimension_numbers = #tpu.dot_dimension_numbers<[1], [0], [0], [1], [0, 0, 1, 1], [], []>} : vector<8x32xbf16>, vector<32x8xbf16>, vector<8x8xf32> -> vector<8x8xf32>
    %6 = arith.truncf %5 : vector<8x8xf32> to vector<8x8xbf16>
    %c0_5 = arith.constant 0 : index
    %c0_6 = arith.constant 0 : index
    %c0_7 = arith.constant 0 : index
    %7 = vector.load %arg4[%c0_5, %c0_6, %c0_7] : memref<1x32x8xbf16, #tpu.memory_space<vmem>>, vector<1x32x8xbf16>
    %8 = vector.shape_cast %7 : vector<1x32x8xbf16> to vector<32x8xbf16>
    %cst_8 = arith.constant dense<0.000000e+00> : vector<8x8xf32>
    %9 = tpu.matmul %2, %8, %cst_8 {dimension_numbers = #tpu.dot_dimension_numbers<[1], [0], [0], [1], [0, 0, 1, 1], [], []>} : vector<8x32xbf16>, vector<32x8xbf16>, vector<8x8xf32> -> vector<8x8xf32>
    %10 = arith.truncf %9 : vector<8x8xf32> to vector<8x8xbf16>
    %c0_9 = arith.constant 0 : index
    %c0_10 = arith.constant 0 : index
    %c0_11 = arith.constant 0 : index
    %11 = vector.load %arg5[%c0_9, %c0_10, %c0_11] : memref<1x32x8xbf16, #tpu.memory_space<vmem>>, vector<1x32x8xbf16>
    %12 = vector.shape_cast %11 : vector<1x32x8xbf16> to vector<32x8xbf16>
    %cst_12 = arith.constant dense<0.000000e+00> : vector<8x8xf32>
    %13 = tpu.matmul %2, %12, %cst_12 {dimension_numbers = #tpu.dot_dimension_numbers<[1], [0], [0], [1], [0, 0, 1, 1], [], []>} : vector<8x32xbf16>, vector<32x8xbf16>, vector<8x8xf32> -> vector<8x8xf32>
    %14 = arith.truncf %13 : vector<8x8xf32> to vector<8x8xbf16>
    %cst_13 = arith.constant dense<0.000000e+00> : vector<8x8xf32>
    %15 = tpu.matmul %6, %10, %cst_13 {dimension_numbers = #tpu.dot_dimension_numbers<[1], [1], [0], [0], [0, 0, 1, 0], [], []>} : vector<8x8xbf16>, vector<8x8xbf16>, vector<8x8xf32> -> vector<8x8xf32>
    %16 = tpu.iota {dimensions = array<i32: 0>} : vector<8x8xi32>
    %17 = tpu.iota {dimensions = array<i32: 1>} : vector<8x8xi32>
    %18 = arith.cmpi sgt, %17, %16 : vector<8x8xi32>
    %cst_14 = arith.constant -1.000000e+30 : f32
    %19 = vector.broadcast %cst_14 : f32 to vector<8x8xf32>
    %20 = arith.select %18, %19, %15 : vector<8x8xi1>, vector<8x8xf32>
    %cst_15 = arith.constant dense<0xFF800000> : vector<8xf32>
    %21 = vector.multi_reduction <maximumf>, %20, %cst_15 [1] : vector<8x8xf32> to vector<8xf32>
    %22 = vector.shape_cast %21 : vector<8xf32> to vector<8x1xf32>
    %23 = vector.broadcast %22 : vector<8x1xf32> to vector<8x8xf32>
    %24 = arith.subf %20, %23 : vector<8x8xf32>
    %25 = math.exp %24 : vector<8x8xf32>
    %cst_16 = arith.constant dense<0.000000e+00> : vector<8xf32>
    %26 = vector.multi_reduction <add>, %25, %cst_16 [1] : vector<8x8xf32> to vector<8xf32>
    %27 = vector.shape_cast %26 : vector<8xf32> to vector<8x1xf32>
    %28 = arith.truncf %25 : vector<8x8xf32> to vector<8x8xbf16>
    %cst_17 = arith.constant dense<0.000000e+00> : vector<8x8xf32>
    %29 = tpu.matmul %28, %14, %cst_17 {dimension_numbers = #tpu.dot_dimension_numbers<[1], [0], [0], [1], [0, 0, 1, 1], [], []>} : vector<8x8xbf16>, vector<8x8xbf16>, vector<8x8xf32> -> vector<8x8xf32>
    %30 = tpu.reciprocal %27 {approx = true} : vector<8x1xf32> -> vector<8x1xf32>
    %31 = vector.broadcast %30 : vector<8x1xf32> to vector<8x8xf32>
    %32 = arith.mulf %29, %31 : vector<8x8xf32>
    %33 = arith.truncf %32 : vector<8x8xf32> to vector<8x8xbf16>
    %c0_18 = arith.constant 0 : index
    %c0_19 = arith.constant 0 : index
    %c0_20 = arith.constant 0 : index
    %34 = vector.load %arg6[%c0_18, %c0_19, %c0_20] : memref<1x8x128xbf16, #tpu.memory_space<vmem>>, vector<1x8x128xbf16>
    %35 = vector.shape_cast %34 : vector<1x8x128xbf16> to vector<8x128xbf16>
    %cst_21 = arith.constant dense<0.000000e+00> : vector<8x128xf32>
    %36 = tpu.matmul %33, %35, %cst_21 {dimension_numbers = #tpu.dot_dimension_numbers<[1], [0], [0], [1], [0, 0, 1, 1], [], []>} : vector<8x8xbf16>, vector<8x128xbf16>, vector<8x128xf32> -> vector<8x128xf32>
    %c0_i32 = arith.constant 0 : i32
    %37 = arith.cmpi eq, %arg1, %c0_i32 : i32
    %38 = arith.extui %37 : i1 to i32
    %c0_i32_22 = arith.constant 0 : i32
    %39 = arith.cmpi ne, %38, %c0_i32_22 : i32
    scf.if %39 {
      %c0_26 = arith.constant 0 : index
      %c0_27 = arith.constant 0 : index
      %46 = vector.load %arg7[%c0_26, %c0_27] : memref<1x128xf32, #tpu.memory_space<vmem>>, vector<1x128xf32>
      %47 = vector.broadcast %46 : vector<1x128xf32> to vector<8x128xf32>
      %48 = arith.addf %47, %36 : vector<8x128xf32>
      %c0_28 = arith.constant 0 : index
      %c0_29 = arith.constant 0 : index
      %49 = vector.load %arg9[%c0_28, %c0_29] : memref<8x128xf32, #tpu.memory_space<vmem>>, vector<8x128xf32>
      tpu.vector_store %arg9[%c0_28, %c0_29], %48 {strides = array<i32>} : memref<8x128xf32, #tpu.memory_space<vmem>>, vector<8x128xf32>,
    } else {
    }
    %c0_i32_23 = arith.constant 0 : i32
    %40 = arith.cmpi sgt, %arg1, %c0_i32_23 : i32
    %41 = arith.extui %40 : i1 to i32
    %c0_i32_24 = arith.constant 0 : i32
    %42 = arith.cmpi ne, %41, %c0_i32_24 : i32
    scf.if %42 {
      %c0_26 = arith.constant 0 : index
      %c0_27 = arith.constant 0 : index
      %46 = vector.load %arg9[%c0_26, %c0_27] : memref<8x128xf32, #tpu.memory_space<vmem>>, vector<8x128xf32>
      %47 = arith.addf %46, %36 : vector<8x128xf32>
      %c0_28 = arith.constant 0 : index
      %c0_29 = arith.constant 0 : index
      %48 = vector.load %arg9[%c0_28, %c0_29] : memref<8x128xf32, #tpu.memory_space<vmem>>, vector<8x128xf32>
      tpu.vector_store %arg9[%c0_28, %c0_29], %47 {strides = array<i32>} : memref<8x128xf32, #tpu.memory_space<vmem>>, vector<8x128xf32>,
    } else {
    }
    %c3_i32 = arith.constant 3 : i32
    %43 = arith.cmpi eq, %arg1, %c3_i32 : i32
    %44 = arith.extui %43 : i1 to i32
    %c0_i32_25 = arith.constant 0 : i32
    %45 = arith.cmpi ne, %44, %c0_i32_25 : i32
    scf.if %45 {
      %c0_26 = arith.constant 0 : index
      %c0_27 = arith.constant 0 : index
      %46 = vector.load %arg9[%c0_26, %c0_27] : memref<8x128xf32, #tpu.memory_space<vmem>>, vector<8x128xf32>
      %c0_28 = arith.constant 0 : index
      %c0_29 = arith.constant 0 : index
      %c0_30 = arith.constant 0 : index
      %47 = vector.load %arg8[%c0_28, %c0_29, %c0_30] : memref<1x8x128xf32, #tpu.memory_space<vmem>>, vector<1x8x128xf32>
      %48 = vector.shape_cast %47 : vector<1x8x128xf32> to vector<8x128xf32>
      %49 = vector.shape_cast %46 : vector<8x128xf32> to vector<1x8x128xf32>
      tpu.vector_store %arg8[%c0_28, %c0_29, %c0_30], %49 {strides = array<i32>} : memref<1x8x128xf32, #tpu.memory_space<vmem>>, vector<1x8x128xf32>,
    } else {
    }
    return
  }
  func.func @transform_0(%arg0: i32, %arg1: i32) -> (i32, i32, i32) {
    %c0_i32 = arith.constant 0 : i32
    %c0_i32_0 = arith.constant 0 : i32
    %c0_i32_1 = arith.constant 0 : i32
    return %arg0, %c0_i32, %c0_i32_0 : i32, i32, i32
  }
  func.func @transform_1(%arg0: i32, %arg1: i32) -> (i32, i32, i32) {
    %c0_i32 = arith.constant 0 : i32
    %c0_i32_0 = arith.constant 0 : i32
    %c0_i32_1 = arith.constant 0 : i32
    return %arg1, %c0_i32, %c0_i32_0 : i32, i32, i32
  }
  func.func @transform_2(%arg0: i32, %arg1: i32) -> (i32, i32, i32) {
    %c0_i32 = arith.constant 0 : i32
    %c0_i32_0 = arith.constant 0 : i32
    %c0_i32_1 = arith.constant 0 : i32
    return %arg1, %c0_i32, %c0_i32_0 : i32, i32, i32
  }
  func.func @transform_3(%arg0: i32, %arg1: i32) -> (i32, i32, i32) {
    %c0_i32 = arith.constant 0 : i32
    %c0_i32_0 = arith.constant 0 : i32
    %c0_i32_1 = arith.constant 0 : i32
    return %arg1, %c0_i32, %c0_i32_0 : i32, i32, i32
  }
  func.func @transform_4(%arg0: i32, %arg1: i32) -> (i32, i32, i32) {
    %c0_i32 = arith.constant 0 : i32
    %c0_i32_0 = arith.constant 0 : i32
    %c0_i32_1 = arith.constant 0 : i32
    return %arg1, %c0_i32, %c0_i32_0 : i32, i32, i32
  }
  func.func @transform_5(%arg0: i32, %arg1: i32) -> (i32, i32) {
    %c0_i32 = arith.constant 0 : i32
    %c0_i32_0 = arith.constant 0 : i32
    %c0_i32_1 = arith.constant 0 : i32
    return %c0_i32, %c0_i32_0 : i32, i32
  }
  func.func @transform_6(%arg0: i32, %arg1: i32) -> (i32, i32, i32) {
    %c0_i32 = arith.constant 0 : i32
    %c0_i32_0 = arith.constant 0 : i32
    %c0_i32_1 = arith.constant 0 : i32
    return %arg0, %c0_i32, %c0_i32_0 : i32, i32, i32
  }
}

</mosaic_0001>

<bundles_post_ra>
// kernel: tpu_custom_call.1
= control target key start
LH: loop header
LB: loop body
LE: loop exit
PB: predicated region body
PF: predicated region fallthrough
CT: control target
= control target key end

     0   :  { %11 = vsyncpa [#allocation4], 0  ;;  %s1092_s0 = inlined_call_operand.vmem [shape: f32[2,8,32], index: 0, kind: input, shape index: {}]   ;;  %s1093_s1 = inlined_call_operand.vmem [shape: bf16[4,32,8], index: 1, kind: input, shape index: {}]   ;;  %s1094_s2 = inlined_call_operand.vmem [shape: bf16[4,32,8], index: 2, kind: input, shape index: {}]   ;;  %s1095_s3 = inlined_call_operand.vmem [shape: bf16[4,32,8], index: 3, kind: input, shape index: {}]   ;;  %s1096_s4 = inlined_call_operand.vmem [shape: bf16[4,8,128], index: 4, kind: input, shape index: {}]   ;;  %s1097_s5 = inlined_call_operand.vmem [shape: f32[1,128], index: 5, kind: input, shape index: {}]   ;;  %s1098_s6 = inlined_call_operand.hbm [shape: f32[2,8,128], index: 6, kind: output, shape index: {}]  }
   0x1   :  { %13 = vsyncpa [#allocation4 + $0x1], 0  ;;  %s936_s21 = smov 0   ;;  %s938_s22 = smov 0  }
   0x2   :  { %s940_s23 = smov 0   ;;  %s942_s24 = smov 0  }
   0x3   :  { %s944_s25 = smov 0   ;;  %s946_s26 = smov 0  }
   0x4   :  { %s948_s27 = smov 0   ;;  %s950_s28 = smov 0  }
   0x5 LB: > { %1102 = sst [smem:[#allocation6_spill]] %s895_s27  ;;  %s669_s29 = sadd.s32 4294967295, %s899_s28   ;;  %s899_s28 = sphi %s950_s28, %s19_s28   ;;  %s895_s27 = sphi %s948_s27, %s1110_s27   ;;  %s891_s26 = sphi %s946_s26, %s1115_s26   ;;  %s887_s25 = sphi %s944_s25, %s1108_s25   ;;  %s883_s24 = sphi %s942_s24, %s1114_s24   ;;  %s879_s23 = sphi %s940_s23, %s1113_s23   ;;  %s875_s22 = sphi %s938_s22, %s1112_s22   ;;  %s871_s21 = sphi %s936_s21, %s1111_s21  }
   0x6   : > { %s670_s30 = sadd.s32 4294967294, %s899_s28   ;;  %s28_s7 = sadd.s32 1, %s891_s26 }
   0x7   : > { %p29_p0 = scmp.ge.s32.totalorder %s28_s7, 4  ;;  %s31_s8 = sadd.s32 1, %s895_s27 }
   0x8   : > { %p199_p1 = scmp.ne.s32.totalorder %s879_s23, %s875_s22  ;;  %p200_p2 = scmp.eq.s32.totalorder %s669_s29, 7 }
   0x9   : > { %s1117_s7 = smov (%p29_p0, %s28_s7), 0  ;;  %s1119_s8 = smov (!%p29_p0, %s31_s8), %s895_s27 }
   0xa   : > { %1103 = sst [smem:[#allocation7_spill]] %s1117_s7  ;;  %p985_p3 = por %p200_p2, %p199_p1 }
   0xb   : > { %p205_p4 = scmp.ne.s32.totalorder %s875_s22, %s871_s21  ;;  %p33_p5 = scmp.ge.s32.totalorder %s1119_s8, 2 }
   0xc   : > { %p206_p6 = scmp.eq.s32.totalorder %s670_s30, 7  ;;  %p673_p7 = scmp.ge.s32.totalorder %s899_s28, 1 }
   0xd   : > { %p265_p8 = scmp.lt.s32.totalorder %s899_s28, 9  ;;  %s1121_s8 = smov (%p33_p5, %s1119_s8), 0 }
   0xe   : > { %1105 = sst [smem:[#allocation8_spill]] %s1121_s8  ;;  %p995_p9 = por %p206_p6, %p205_p4 }
   0xf   : > { %p266_p10 = pnand %p673_p7, %p265_p8  ;;  %s186_s11 = ssub.s32 %s895_s27, %s1121_s8 }
  0x10   : > { %s189_s12 = sadd.s32 1, %s879_s23  ;;  %p187_p11 = scmp.eq.s32.totalorder %s186_s11, 0 }
  0x11   : > { %269 = sbr.rel (%p266_p10) target bundleno = 737 (0x2e1), region = 44  ;;  %s1100_s14 = sand.u32 (!%p266_p10), 1, %s875_s22  }
  0x12   : > { %s1003_s13 = scalar_select %p187_p11, %s879_s23, %s189_s12  }
  0x13   : > { %p317_p12 = scmp.lt.s32.totalorder (!%p266_p10), %s883_s24, 3  ;;  %s1009_s15 = sshll.u32 (!%p266_p10), %s1100_s14, 3 }
  0x14   : > { %p313_p13 = scmp.lt.s32.totalorder (!%p266_p10), %s887_s25, 1  ;;  %p713_p0 = scmp.ne.s32.totalorder (!%p266_p10), %s883_s24, 0 }
  0x16   : > { %s1013_s16 = scalar_select %p317_p12, %s883_s24, 3  ;;  %vm355_vm0 = vcmask 261120   ;;  %vm433_vm1 = vcmask 64512   ;;  %vm472_vm2 = vcmask 1043456   ;;  %v453_v19 = vlaneseq }
  0x17   : > { %s314_s17 = scalar_select %p313_p13, %s887_s25, 1 }
  0x18   : > { %s720_s18 = sshll.u32 %s1013_s16, 4  ;;  %v454_v20 = vshrl.u32 %v453_v19, 7  ;;  %v456_v21 = vand.u32 127, %v453_v19 }
  0x19   : > { %s321_s29 = scalar_lea.vmem %s1093_s1, %s720_s18  ;;  %s326_s12 = scalar_lea.vmem %s1094_s2, %s720_s18 }
  0x1a   : > { %v724_v0 = vld [vmem:[%s321_s29 + $0x8] sm:$0xff]  ;;  %s675_s8 = sshll.u32 %s314_s17, 3  ;;  %v723_v2 = vld [vmem:[%s321_s29] sm:$0xff]  ;;  %s331_s30 = scalar_lea.vmem %s1095_s3, %s720_s18  ;;  %vm457_vm3 = vcmp.gt.s32.totalorder %v456_v21, %v454_v20 }
  0x1b   : > { %v726_v1 = vld [vmem:[%s326_s12 + $0x8] sm:$0xff]  ;;  %s316_s27 = scalar_lea.vmem %s1092_s0, %s675_s8  ;;  %365 = vmatpush.bf16.msra.mxu0 %v724_v0  ;;  %v725_v3 = vld [vmem:[%s326_s12] sm:$0xff] }
  0x1c   : > { %395 = vmatpush.bf16.msra.mxu1 %v726_v1  ;;  %v337_v4 = vld [vmem:[%s316_s27] sm:$0xff]  ;;  %v728_v6 = vld [vmem:[%s331_s30 + $0x8] sm:$0xff]  ;;  %s682_s27 = sshll.u32 %s1013_s16, 2  ;;  %s312_s16 = scalar_lea.vmem [#allocation3], %s1009_s15 }
  0x1d   : > { %v338_v5 = vpack.c.bf16 %v337_v4, %v337_v4  ;;  %425 = vmatpush.bf16.msra.mxu2 %v728_v6  ;;  %v727_v7 = vld [vmem:[%s331_s30] sm:$0xff]  ;;  %s335_s14 = scalar_lea.vmem %s1096_s4, %s682_s27 }
  0x1e   : > { %v492_v26 = vld [vmem:[%s335_s14] sm:$0xf] }
  0x1f   : > { %366 = vmatpush.bf16.msra.mxu0 %v723_v2  ;;  %v497_v27 = vsel %vm472_vm2, %v492_v26, 0 }
  0x20   : > { %396 = vmatpush.bf16.msra.mxu1 %v725_v3 }
  0x21   : > { %426 = vmatpush.bf16.msra.mxu2 %v727_v7 }
  0x22   : > { %691 = vmatmul.msk.bf16.vlgmr.msra.gmra.mxu0 %vm355_vm0, %v338_v5 }
  0x23   : > { %700 = vmatmul.msk.bf16.vlgmr.msra.gmra.mxu1 %vm355_vm0, %v338_v5 }
  0x24   : > { %709 = vmatmul.msk.bf16.vlgmr.msra.gmra.mxu2 %vm355_vm0, %v338_v5  ;;  %506 = vmatpush.bf16.msrb.mxu1 %v497_v27 }
  0x9f   : > { %v368_v8 = vpop.f32.mrf.mxu0 }
  0xa0   : > { %v398_v9 = vpop.f32.mrf.mxu1  ;;  %v372_v12 = vpack.c.bf16 %v368_v8, %v368_v8 }
  0xa1   : > { %v402_v10 = vpack.c.bf16 %v398_v9, %v398_v9 }
  0xa3   : > { %v438_v11 = vsel %vm433_vm1, %v402_v10, 0 }
  0xa4   : > { %447 = vmatpush.bf16.xpose.msra.mxu3 %v438_v11 }
  0xa7   : > { %v370_v13 = vpop.f32.mrf.mxu0  ;;  %v428_v15 = vpop.f32.mrf.mxu2 }
  0xa8   : > { %v400_v14 = vpop.f32.mrf.mxu1  ;;  %v432_v16 = vpack.c.bf16 %v428_v15, %v428_v15 }
  0xaa   : > { %v474_v17 = vsel %vm472_vm2, %v432_v16, 0 }
  0xab   : > { %710 = vmatmul.msk.bf16.vlgmr.msra.gmra.mxu3 %vm433_vm1, %v372_v12  ;;  %483 = vmatpush.bf16.msrb.mxu0 %v474_v17 }
  0xaf   : > { %v430_v18 = vpop.f32.mrf.mxu2 }
 0x12e   : > { %v449_v22 = vpop.f32.mrf.mxu3 }
 0x12f   : > { %v458_v23 = vsel %vm457_vm3, -1e+30, %v449_v22 }
 0x130   : > { %v459_v24 = vsel %vm433_vm1, %v458_v23, -inf }
 0x131   : > { %460 = vmax.xlane.f32.xlu0 %v459_v24 }
 0x136   : > { %v451_v25 = vpop.f32.mrf.mxu3 }
 0x1a4   : > { %v461_v28 = vpop.xlane.xlu0 %460 }
 0x1a5   : > { %v462_v29 = vsub.f32 %v458_v23, %v461_v28 }
 0x1a7   : > { %v463_v30 = vmul.f32 1.442695, %v462_v29 }
 0x1a9   : > { %800 = vpow2.f32 %v463_v30 }
 0x1af   : > { %v801_v31 = vpop.eup %800 }
 0x1b0   : > { %v465_v32 = vsel %vm433_vm1, %v801_v31, 0.0  ;;  %v468_v33 = vpack.c.bf16 %v801_v31, %v801_v31 }
 0x1b1   : > { %466 = vadd.xlane.f32.xlu0 %v465_v32 }
 0x1b2   : > { %711 = vmatmul.msk.bf16.vlgmr.msrb.gmra.mxu0 %vm433_vm1, %v468_v33 }
 0x224   : > { %v467_v34 = vpop.xlane.xlu0 %466 }
 0x225   : > { %802 = vrcp.f32 %v467_v34 }
 0x22b   : > { %v803_v35 = vpop.eup %802 }
 0x22f   : > { %v485_v36 = vpop.f32.mrf.mxu0 }
 0x230   : > { %v490_v37 = vmul.f32 %v803_v35, %v485_v36 }
 0x232   : > { %v491_v38 = vpack.c.bf16 %v490_v37, %v490_v37 }
 0x234   : > { %712 = vmatmul.msk.bf16.vlgmr.msrb.gmra.mxu1 %vm433_vm1, %v491_v38 }
 0x237   : > { %v487_v39 = vpop.f32.mrf.mxu0 }
 0x2b1   : > { %v508_v40 = vpop.f32.mrf.mxu1 }
 0x2b5   : > { %515 = sbr.rel (%p713_p0) target bundleno = 702 (0x2be), region = 48 }
 0x2b9   : > { %v510_v41 = vpop.f32.mrf.mxu1 }
 0x2ba   : > { %v804_v42 = vld [vmem:[%s1097_s5] ss:$0 sm:$0xff] }
 0x2bb   : > { %v520_v43 = vadd.f32 %v804_v42, %v508_v40 }
 0x2bd   : > { %521 = vst [vmem:[#allocation2] sm:$0xff] %v520_v43 }
 0x2be PF: > { %p714_p1 = scmp.le.s32.totalorder %s883_s24, 0 }
 0x2c0   : > { %525 = sbr.rel (%p714_p1) target bundleno = 713 (0x2c9), region = 52 }
 0x2c5   : > { %v526_v44 = vld [vmem:[#allocation2] sm:$0xff] }
 0x2c6   : > { %v527_v45 = vadd.f32 %v526_v44, %v508_v40 }
 0x2c8   : > { %528 = vst [vmem:[#allocation2] sm:$0xff] %v527_v45 }
 0x2c9 PF: > { %p715_p2 = scmp.ne.s32.totalorder %s883_s24, 3 }
 0x2cb   : > { %532 = sbr.rel (%p715_p2) target bundleno = 722 (0x2d2), region = 56 }
 0x2d0   : > { %v533_v46 = vld [vmem:[#allocation2] sm:$0xff] }
 0x2d1   : > { %534 = vst [vmem:[%s312_s16] sm:$0xff] %v533_v46 }
 0x2d2 PF: > { %s717_s15 = sshll.u32 %s887_s25, 3  ;;  %s548_s19 = sshll.u32 %s312_s16, 4  ;;  %s549_s19 = int_to_ptr.vmem [resolvable:$true] %s548_s19 }
 0x2d3   : > { %s546_s12 = scalar_lea.hbm %s1098_s6, %s717_s15  ;;  %s1107_s30 = sand.u32 1, %s875_s22  }
 0x2d4   : > { %s550_s20 = sshll.u32 %s546_s12, 4  ;;  %s536_s27 = scalar_lea.sflag [#allocation4], %s1107_s30  ;;  %s551_s20 = int_to_ptr.hbm [resolvable:$true] %s550_s20 }
 0x2d5   : > { %s819_s7 = sshra.s32 %s551_s20, 4  ;;  %s825_s25 = scalar_lea.hbm %s1098_s6, 16  ;;  %s820_s7 = int_to_ptr.hbm [resolvable:$true] %s819_s7 }
 0x2d6   : > { %s821_s24 = scalar_lea.hbm %s820_s7, 8  ;;  %p826_p7 = scmp.lt.s32.totalorder %s820_s7, %s1098_s6 }
 0x2d7   : > { %p822_p4 = scmp.ne.s32.totalorder %s820_s7, %s821_s24  ;;  %p827_p8 = scmp.lt.s32.totalorder %s825_s25, %s821_s24 }
 0x2d9   : > { %p823_p5 = pnand %p822_p4, %p985_p3  ;;  %p828_p10 = por %p827_p8, %p826_p7 }
 0x2db   : > { %p824_p6 = pneg %p823_p5 }
 0x2dd   : > { %p829_p11 = pnand %p828_p10, %p824_p6 }
 0x2df   : > { %832 = shalt.err (!%p829_p11)
}
 0x2e0   : > { %729 = dma.vmem_to_hbm [thread:$0]  (%p985_p3), %s549_s19, 128, %s551_s20, %s536_s27  }
 0x2e1 PF: > { %p735_p12 = scmp.ge.s32.totalorder %s899_s28, 2  ;;  %s562_s16 = sand.u32 1, %s871_s21  }
 0x2e2   : > { %s563_s15 = scalar_lea.sflag [#allocation4], %s562_s16 }
 0x2e3   : > { %p732_p13 = pnand %p735_p12, %p995_p9 }
 0x2e5   : > { %p733_p0 = pneg %p732_p13 }
 0x2e7   : > { %866 = dma.done.wait (%p733_p0), %s563_s15, 128  }
 0x2e8   : > { %868 = vsyncadd (%p733_p0), %s563_s15, 4294967168  ;;  %s19_s28 = sadd.s32 1, %s899_s28   ;;  %s1108_s25 = sld [smem:[#allocation6_spill]] }
 0x2e9   : > { %p16_p1 = scmp.ge.s32.totalorder %s19_s28, 10   ;;  %s1109_s9 = sld [smem:[#allocation7_spill]] }
 0x2ea   : > { %s1110_s27 = sld [smem:[#allocation8_spill]]  ;;  %s1111_s21 = smov %s875_s22 }
 0x2eb   : > { %s1112_s22 = smov %s879_s23  ;;  %s1113_s23 = smov %s1003_s13 }
 0x2ec   : > { %s1114_s24 = smov %s891_s26  ;;  %18 = sbr.rel (!%p16_p1) target bundleno = 5 (0x5), region = 103 }
 0x2ef   : > { %s1115_s26 = smov %s1109_s9 }
 0x2f1   :  { %569 = vsyncpa [#allocation4], 1 }
 0x2f2   :  { %571 = vsyncpa [#allocation4 + $0x1], 1 }

</bundles_post_ra>
